<compile_context>
chip_gen: v5e
topology: v5e:2x2
jax: 0.10.0
libtpu: 0.0.40
codegen_flags: <defaults>
</compile_context>

<pallas_src>
import jax
import jax.numpy as jnp
import numpy as np
from jax.experimental import pallas as pl
from jax.experimental.pallas import tpu as pltpu

K = 4            # Conv2d kernel size
STRIDE = 2
PAD = 1
EPS = 1e-5       # InstanceNorm2d default
SLOPE = 0.2      # LeakyReLU negative_slope in UNetDown


def _make_down_kernel(Ho, Wo):
    """Pallas kernel: one batch element x one Cout tile per grid step.

    Ref shapes:
      x_ref : (1, Ho+1, Wo+1, 4*Cin)  bf16  space-to-depth padded input
      w_ref : (2, 2, 4*Cin, Tco)      bf16  phase-packed conv weights
      g_ref : (1, Tco)                f32   InstanceNorm gamma
      b_ref : (1, Tco)                f32   InstanceNorm beta
      o_ref : (1, Ho*Wo, Tco)         f32   output (flattened HW)
    """

    def kernel(x_ref, w_ref, g_ref, b_ref, o_ref):
        C4 = x_ref.shape[-1]
        x = x_ref[0]                                # (Ho+1, Wo+1, 4*Cin) bf16

        # 2x2 stride-1 conv over the space-to-depth input: 4 MXU matmuls with
        # a 4*Cin contraction, f32 accumulation carried in values.
        acc = None
        for dy in range(2):
            for dx in range(2):
                patch = x[dy:dy + Ho, dx:dx + Wo, :].reshape(Ho * Wo, C4)
                contrib = jnp.dot(patch, w_ref[dy, dx],
                                  preferred_element_type=jnp.float32)
                acc = contrib if acc is None else acc + contrib

        # InstanceNorm2d (biased variance, per-channel spatial stats) + affine
        # folded into one scale/shift over the big tile, then LeakyReLU(0.2).
        mean = jnp.mean(acc, axis=0, keepdims=True)               # (1, Tco)
        var = jnp.mean((acc - mean) ** 2, axis=0, keepdims=True)  # biased
        scale = g_ref[...] * jax.lax.rsqrt(var + EPS)
        shift = b_ref[...] - mean * scale
        y = acc * scale + shift
        o_ref[0] = jnp.maximum(y, SLOPE * y)        # LeakyReLU (slope < 1)

    return kernel


def _pick_cout_tile(cout):
    for t in (256, 128):
        if cout % t == 0:
            return t
    return cout


def _round_up(v, m):
    return (v + m - 1) // m * m


def unet_down(x, params):
    """x: float32 (N, Cin, H, W) -> float32 (N, Cout, H//2, W//2)."""
    N, Cin, H, W = x.shape
    Cout = params["w"].shape[0]
    assert H % 2 == 0 and W % 2 == 0
    Ho, Wo = H // STRIDE, W // STRIDE
    C4 = 4 * Cin
    Tco = _pick_cout_tile(Cout)
    n_ct = Cout // Tco

    # ---- wrapper-side layout prep (cheap XLA glue) -------------------------
    # pad=1 then space-to-depth by 2: NCHW -> (N, Ho+1, Wo+1, 4*Cin), in a
    # single transpose.  Packed-channel order = (row-parity a, col-parity b,
    # ci).
    xp = jnp.pad(x.astype(jnp.float32), ((0, 0), (0, 0), (PAD, PAD), (PAD, PAD)))
    xs = xp.reshape(N, Cin, Ho + 1, 2, Wo + 1, 2)
    xs = jnp.transpose(xs, (0, 2, 4, 3, 5, 1)).reshape(N, Ho + 1, Wo + 1, C4)
    xs = xs.astype(jnp.bfloat16)

    # Conv2d weight (Cout, Cin, 4, 4) -> phase-packed (2, 2, 4*Cin, Cout):
    #   W2[dy, dx, (a*2 + b)*Cin + ci, co] = W[co, ci, 2*dy + a, 2*dx + b]
    w = params["w"].astype(jnp.float32).reshape(Cout, Cin, 2, 2, 2, 2)
    w2 = jnp.transpose(w, (2, 4, 3, 5, 1, 0)).reshape(2, 2, C4, Cout)
    w2 = w2.astype(jnp.bfloat16)

    gamma = params["gamma"].reshape(1, Cout).astype(jnp.float32)
    beta = params["beta"].reshape(1, Cout).astype(jnp.float32)

    kernel = _make_down_kernel(Ho, Wo)

    # VMEM budget estimate (double-buffered tiles) with headroom.
    xb = (Ho + 1) * _round_up(Wo + 1, 8) * _round_up(C4, 128) * 2
    wb = 4 * _round_up(C4, 8) * _round_up(Tco, 128) * 2
    ob = _round_up(Ho * Wo, 8) * _round_up(Tco, 128) * 4
    est = 2 * (xb + wb + ob) + 2 * ob + (1 << 20)
    vmem_limit = int(min(64 * 1024 * 1024, max(32 * 1024 * 1024, 2 * est)))

    cost = pl.CostEstimate(
        flops=2 * N * Ho * Wo * (K * K * Cin) * Cout,
        transcendentals=0,
        bytes_accessed=(xs.size * 2 + w2.size * 2
                        + N * Ho * Wo * Cout * 4 + 2 * Cout * 4),
    )

    out = pl.pallas_call(
        kernel,
        out_shape=jax.ShapeDtypeStruct((N, Ho * Wo, Cout), jnp.float32),
        grid_spec=pltpu.PrefetchScalarGridSpec(
            num_scalar_prefetch=0,
            grid=(N, n_ct),
            in_specs=[
                pl.BlockSpec((1, Ho + 1, Wo + 1, C4), lambda n, j: (n, 0, 0, 0)),
                pl.BlockSpec((2, 2, C4, Tco), lambda n, j: (0, 0, 0, j)),
                pl.BlockSpec((1, Tco), lambda n, j: (0, j)),
                pl.BlockSpec((1, Tco), lambda n, j: (0, j)),
            ],
            out_specs=pl.BlockSpec((1, Ho * Wo, Tco), lambda n, j: (n, 0, j)),
        ),
        compiler_params=pltpu.CompilerParams(
            dimension_semantics=("parallel", "parallel"),
            vmem_limit_bytes=vmem_limit),
        cost_estimate=cost,
    )(xs, w2, gamma, beta)

    out = out.reshape(N, Ho, Wo, Cout)
    return jnp.transpose(out, (0, 3, 1, 2))          # back to NCHW


def reference(x, params):
    """Pure-JAX f32 reference of the same forward pass (for validation)."""
    xf = x.astype(jnp.float32)
    w = params["w"].astype(jnp.float32)
    y = jax.lax.conv_general_dilated(
        xf, w, window_strides=(STRIDE, STRIDE),
        padding=((PAD, PAD), (PAD, PAD)),
        dimension_numbers=("NCHW", "OIHW", "NCHW"))
    m = y.mean(axis=(2, 3), keepdims=True)
    v = ((y - m) ** 2).mean(axis=(2, 3), keepdims=True)
    yn = (y - m) / jnp.sqrt(v + EPS)
    yn = yn * params["gamma"].reshape(1, -1, 1, 1) + params["beta"].reshape(1, -1, 1, 1)
    return jnp.where(yn >= 0, yn, SLOPE * yn)


if __name__ == "__main__":
    key = jax.random.PRNGKey(0)
    ks = jax.random.split(key, 4)

    N, Cin, Cout, H, W = 2, 4, 8, 16, 16          # small synthetic shapes
    x = jax.random.normal(ks[0], (N, Cin, H, W), jnp.float32)

    params = dict(
        # Conv2d weight, PyTorch layout (Cout, Cin, K, K)
        w=0.1 * jax.random.normal(ks[1], (Cout, Cin, K, K), jnp.float32),
        # InstanceNorm2d affine params
        gamma=1.0 + 0.1 * jax.random.normal(ks[2], (Cout,), jnp.float32),
        beta=0.1 * jax.random.normal(ks[3], (Cout,), jnp.float32),
    )

    out = unet_down(x, params)
    out = jax.block_until_ready(out)

    ref = reference(x, params)
    # Tolerance loosened vs f32 reference because the MXU matmuls use bf16
    # operands (f32 accumulation).
    np.testing.assert_allclose(np.asarray(out), np.asarray(ref),
                               rtol=3e-2, atol=3e-2)
    assert out.shape == (N, Cout, H // 2, W // 2)
    assert out.dtype == jnp.float32
    print("KERNEL_OK")
</pallas_src>

<mosaic_0001>
module attributes {stable_mosaic.version = 11 : i64} {
  func.func @kernel(%arg0: i32, %arg1: i32, %arg2: memref<1x9x9x16xbf16, #tpu.memory_space<vmem>>, %arg3: memref<2x2x16x8xbf16, #tpu.memory_space<vmem>>, %arg4: memref<1x8xf32, #tpu.memory_space<vmem>>, %arg5: memref<1x8xf32, #tpu.memory_space<vmem>>, %arg6: memref<1x64x8xf32, #tpu.memory_space<vmem>>) attributes {dimension_semantics = [#tpu.dimension_semantics<parallel>, #tpu.dimension_semantics<parallel>], iteration_bounds = array<i64: 2, 1>, scalar_prefetch = 0 : i64, scratch_operands = 0 : i64, tpu.core_type = #tpu.core_type<tc>, window_params = [{transform_indices = @transform_0, window_bounds = array<i64: 1, 9, 9, 16>}, {transform_indices = @transform_1, window_bounds = array<i64: 2, 2, 16, 8>}, {transform_indices = @transform_2, window_bounds = array<i64: 1, 8>}, {transform_indices = @transform_3, window_bounds = array<i64: 1, 8>}, {transform_indices = @transform_4, window_bounds = array<i64: 1, 64, 8>}]} {
    %c0 = arith.constant 0 : index
    %c0_0 = arith.constant 0 : index
    %c0_1 = arith.constant 0 : index
    %c0_2 = arith.constant 0 : index
    %0 = vector.load %arg2[%c0, %c0_0, %c0_1, %c0_2] : memref<1x9x9x16xbf16, #tpu.memory_space<vmem>>, vector<1x9x9x16xbf16>
    %1 = vector.shape_cast %0 : vector<1x9x9x16xbf16> to vector<9x9x16xbf16>
    %2 = vector.extract_strided_slice %1 {offsets = [0, 0, 0], sizes = [8, 8, 16], strides = [1, 1, 1]} : vector<9x9x16xbf16> to vector<8x8x16xbf16>
    %3 = vector.shape_cast %2 : vector<8x8x16xbf16> to vector<64x16xbf16>
    %c0_3 = arith.constant 0 : index
    %c0_4 = arith.constant 0 : index
    %c0_5 = arith.constant 0 : index
    %c0_6 = arith.constant 0 : index
    %4 = vector.load %arg3[%c0_3, %c0_4, %c0_5, %c0_6] : memref<2x2x16x8xbf16, #tpu.memory_space<vmem>>, vector<1x1x16x8xbf16>
    %5 = vector.shape_cast %4 : vector<1x1x16x8xbf16> to vector<16x8xbf16>
    %cst = arith.constant dense<0.000000e+00> : vector<64x8xf32>
    %6 = tpu.matmul %3, %5, %cst {dimension_numbers = #tpu.dot_dimension_numbers<[1], [0], [0], [1], [0, 0, 1, 1], [], []>} : vector<64x16xbf16>, vector<16x8xbf16>, vector<64x8xf32> -> vector<64x8xf32>
    %7 = vector.extract_strided_slice %1 {offsets = [0, 1, 0], sizes = [8, 8, 16], strides = [1, 1, 1]} : vector<9x9x16xbf16> to vector<8x8x16xbf16>
    %8 = vector.shape_cast %7 : vector<8x8x16xbf16> to vector<64x16xbf16>
    %c0_7 = arith.constant 0 : index
    %c1 = arith.constant 1 : index
    %c0_8 = arith.constant 0 : index
    %c0_9 = arith.constant 0 : index
    %9 = vector.load %arg3[%c0_7, %c1, %c0_8, %c0_9] : memref<2x2x16x8xbf16, #tpu.memory_space<vmem>>, vector<1x1x16x8xbf16>
    %10 = vector.shape_cast %9 : vector<1x1x16x8xbf16> to vector<16x8xbf16>
    %cst_10 = arith.constant dense<0.000000e+00> : vector<64x8xf32>
    %11 = tpu.matmul %8, %10, %cst_10 {dimension_numbers = #tpu.dot_dimension_numbers<[1], [0], [0], [1], [0, 0, 1, 1], [], []>} : vector<64x16xbf16>, vector<16x8xbf16>, vector<64x8xf32> -> vector<64x8xf32>
    %12 = arith.addf %6, %11 : vector<64x8xf32>
    %13 = vector.extract_strided_slice %1 {offsets = [1, 0, 0], sizes = [8, 8, 16], strides = [1, 1, 1]} : vector<9x9x16xbf16> to vector<8x8x16xbf16>
    %14 = vector.shape_cast %13 : vector<8x8x16xbf16> to vector<64x16xbf16>
    %c1_11 = arith.constant 1 : index
    %c0_12 = arith.constant 0 : index
    %c0_13 = arith.constant 0 : index
    %c0_14 = arith.constant 0 : index
    %15 = vector.load %arg3[%c1_11, %c0_12, %c0_13, %c0_14] : memref<2x2x16x8xbf16, #tpu.memory_space<vmem>>, vector<1x1x16x8xbf16>
    %16 = vector.shape_cast %15 : vector<1x1x16x8xbf16> to vector<16x8xbf16>
    %cst_15 = arith.constant dense<0.000000e+00> : vector<64x8xf32>
    %17 = tpu.matmul %14, %16, %cst_15 {dimension_numbers = #tpu.dot_dimension_numbers<[1], [0], [0], [1], [0, 0, 1, 1], [], []>} : vector<64x16xbf16>, vector<16x8xbf16>, vector<64x8xf32> -> vector<64x8xf32>
    %18 = arith.addf %12, %17 : vector<64x8xf32>
    %19 = vector.extract_strided_slice %1 {offsets = [1, 1, 0], sizes = [8, 8, 16], strides = [1, 1, 1]} : vector<9x9x16xbf16> to vector<8x8x16xbf16>
    %20 = vector.shape_cast %19 : vector<8x8x16xbf16> to vector<64x16xbf16>
    %c1_16 = arith.constant 1 : index
    %c1_17 = arith.constant 1 : index
    %c0_18 = arith.constant 0 : index
    %c0_19 = arith.constant 0 : index
    %21 = vector.load %arg3[%c1_16, %c1_17, %c0_18, %c0_19] : memref<2x2x16x8xbf16, #tpu.memory_space<vmem>>, vector<1x1x16x8xbf16>
    %22 = vector.shape_cast %21 : vector<1x1x16x8xbf16> to vector<16x8xbf16>
    %cst_20 = arith.constant dense<0.000000e+00> : vector<64x8xf32>
    %23 = tpu.matmul %20, %22, %cst_20 {dimension_numbers = #tpu.dot_dimension_numbers<[1], [0], [0], [1], [0, 0, 1, 1], [], []>} : vector<64x16xbf16>, vector<16x8xbf16>, vector<64x8xf32> -> vector<64x8xf32>
    %24 = arith.addf %18, %23 : vector<64x8xf32>
    %cst_21 = arith.constant dense<0.000000e+00> : vector<8xf32>
    %25 = vector.multi_reduction <add>, %24, %cst_21 [0] : vector<64x8xf32> to vector<8xf32>
    %26 = vector.shape_cast %25 : vector<8xf32> to vector<1x8xf32>
    %cst_22 = arith.constant 6.400000e+01 : f32
    %27 = vector.broadcast %cst_22 : f32 to vector<1x8xf32>
    %28 = arith.divf %26, %27 : vector<1x8xf32>
    %29 = vector.broadcast %28 : vector<1x8xf32> to vector<64x8xf32>
    %30 = arith.subf %24, %29 : vector<64x8xf32>
    %31 = arith.mulf %30, %30 : vector<64x8xf32>
    %cst_23 = arith.constant dense<0.000000e+00> : vector<8xf32>
    %32 = vector.multi_reduction <add>, %31, %cst_23 [0] : vector<64x8xf32> to vector<8xf32>
    %33 = vector.shape_cast %32 : vector<8xf32> to vector<1x8xf32>
    %cst_24 = arith.constant 6.400000e+01 : f32
    %34 = vector.broadcast %cst_24 : f32 to vector<1x8xf32>
    %35 = arith.divf %33, %34 : vector<1x8xf32>
    %c0_25 = arith.constant 0 : index
    %c0_26 = arith.constant 0 : index
    %36 = vector.load %arg4[%c0_25, %c0_26] : memref<1x8xf32, #tpu.memory_space<vmem>>, vector<1x8xf32>
    %cst_27 = arith.constant 9.99999974E-6 : f32
    %37 = vector.broadcast %cst_27 : f32 to vector<1x8xf32>
    %38 = arith.addf %35, %37 : vector<1x8xf32>
    %39 = math.rsqrt %38 : vector<1x8xf32>
    %40 = arith.mulf %36, %39 : vector<1x8xf32>
    %c0_28 = arith.constant 0 : index
    %c0_29 = arith.constant 0 : index
    %41 = vector.load %arg5[%c0_28, %c0_29] : memref<1x8xf32, #tpu.memory_space<vmem>>, vector<1x8xf32>
    %42 = arith.mulf %28, %40 : vector<1x8xf32>
    %43 = arith.subf %41, %42 : vector<1x8xf32>
    %44 = vector.broadcast %40 : vector<1x8xf32> to vector<64x8xf32>
    %45 = arith.mulf %24, %44 : vector<64x8xf32>
    %46 = vector.broadcast %43 : vector<1x8xf32> to vector<64x8xf32>
    %47 = arith.addf %45, %46 : vector<64x8xf32>
    %cst_30 = arith.constant 2.000000e-01 : f32
    %48 = vector.broadcast %cst_30 : f32 to vector<64x8xf32>
    %49 = arith.mulf %48, %47 : vector<64x8xf32>
    %50 = arith.maximumf %47, %49 : vector<64x8xf32>
    %c0_31 = arith.constant 0 : index
    %c0_32 = arith.constant 0 : index
    %c0_33 = arith.constant 0 : index
    %51 = vector.load %arg6[%c0_31, %c0_32, %c0_33] : memref<1x64x8xf32, #tpu.memory_space<vmem>>, vector<1x64x8xf32>
    %52 = vector.shape_cast %51 : vector<1x64x8xf32> to vector<64x8xf32>
    %53 = vector.shape_cast %50 : vector<64x8xf32> to vector<1x64x8xf32>
    tpu.vector_store %arg6[%c0_31, %c0_32, %c0_33], %53 {strides = array<i32>} : memref<1x64x8xf32, #tpu.memory_space<vmem>>, vector<1x64x8xf32>,
    return
  }
  func.func @transform_0(%arg0: i32, %arg1: i32) -> (i32, i32, i32, i32) {
    %c0_i32 = arith.constant 0 : i32
    %c0_i32_0 = arith.constant 0 : i32
    %c0_i32_1 = arith.constant 0 : i32
    %c0_i32_2 = arith.constant 0 : i32
    return %arg0, %c0_i32, %c0_i32_0, %c0_i32_1 : i32, i32, i32, i32
  }
  func.func @transform_1(%arg0: i32, %arg1: i32) -> (i32, i32, i32, i32) {
    %c0_i32 = arith.constant 0 : i32
    %c0_i32_0 = arith.constant 0 : i32
    %c0_i32_1 = arith.constant 0 : i32
    %c0_i32_2 = arith.constant 0 : i32
    return %c0_i32, %c0_i32_0, %c0_i32_1, %arg1 : i32, i32, i32, i32
  }
  func.func @transform_2(%arg0: i32, %arg1: i32) -> (i32, i32) {
    %c0_i32 = arith.constant 0 : i32
    %c0_i32_0 = arith.constant 0 : i32
    return %c0_i32, %arg1 : i32, i32
  }
  func.func @transform_3(%arg0: i32, %arg1: i32) -> (i32, i32) {
    %c0_i32 = arith.constant 0 : i32
    %c0_i32_0 = arith.constant 0 : i32
    return %c0_i32, %arg1 : i32, i32
  }
  func.func @transform_4(%arg0: i32, %arg1: i32) -> (i32, i32, i32) {
    %c0_i32 = arith.constant 0 : i32
    %c0_i32_0 = arith.constant 0 : i32
    return %arg0, %c0_i32, %arg1 : i32, i32, i32
  }
}

</mosaic_0001>

<bundles_post_ra>
// kernel: tpu_custom_call.1
= control target key start
LH: loop header
LB: loop body
LE: loop exit
PB: predicated region body
PF: predicated region fallthrough
CT: control target
= control target key end

     0   :  { %s1053_s15 = smov 0   ;;  %s1055_s16 = smov 0   ;;  %s1251_s0 = inlined_call_operand.vmem [shape: bf16[2,9,9,16], index: 0, kind: input, shape index: {}]   ;;  %s1252_s1 = inlined_call_operand.vmem [shape: bf16[2,2,16,8], index: 1, kind: input, shape index: {}]   ;;  %s1253_s2 = inlined_call_operand.vmem [shape: f32[1,8], index: 2, kind: input, shape index: {}]   ;;  %s1254_s3 = inlined_call_operand.vmem [shape: f32[1,8], index: 3, kind: input, shape index: {}]   ;;  %s1255_s4 = inlined_call_operand.vmem [shape: f32[2,64,8], index: 4, kind: output, shape index: {}]  }
   0x1   :  { %s1057_s17 = smov 0  }
   0x2 LB: > { %s26_s18 = sadd.s32 1, %s1021_s16  ;;  %p924_p0 = scmp.ge.s32.totalorder %s1025_s17, 1  ;;  %s1025_s17 = sphi %s1057_s17, %s14_s17   ;;  %s1021_s16 = sphi %s1055_s16, %s1259_s16   ;;  %s1017_s15 = sphi %s1053_s15, %s1258_s15  }
   0x3   : > { %p28_p1 = scmp.ge.s32.totalorder %s26_s18, 2  ;;  %p201_p2 = scmp.lt.s32.totalorder %s1025_s17, 3 }
   0x5   : > { %s1261_s18 = smov (%p28_p1, %s26_s18), 0  ;;  %p202_p3 = pnand %p924_p0, %p201_p2 }
   0x6   : > { %p240_p4 = scmp.lt.s32.totalorder (!%p202_p3), %s1017_s15, 1 }
   0x7   : > { %205 = sbr.rel (%p202_p3) target bundleno = 313 (0x139), region = 36 }
   0xc   : > { %v971_v0 = vld [vmem:[%s1252_s1 + $0x10] sm:$0xff]  ;;  %v969_v1 = vld [vmem:[%s1252_s1] sm:$0xff]  ;;  %v970_v2 = vld [vmem:[%s1252_s1 + $0x8] sm:$0xff]  ;;  %s1263_s15 = smov (!%p240_p4, %s1017_s15), 1  ;;  %vm420_vm0 = vcmask 130048   ;;  %vm670_vm4 = vcmask 64512  }
   0xd   : > { %v972_v3 = vld [vmem:[%s1252_s1 + $0x18] sm:$0xff]  ;;  %563 = vmatpush.bf16.msra.mxu2 %v971_v0  ;;  %507 = vmatpush.bf16.msra.mxu1 %v969_v1  ;;  %s973_s27 = smul.u32 72, %s1263_s15  ;;  %vm284_vm1 = vsmask.f32 3328  ;;  %vm285_vm2 = vsmask.f32 7440 }
   0xe   : > { %440 = vmatpush.bf16.msra.mxu0 %v970_v2  ;;  %640 = vmatpush.bf16.msra.mxu3 %v972_v3  ;;  %vm1108_vm3 = vmor %vm284_vm1, %vm285_vm2  ;;  %s968_s9 = sshll.u32 %s1263_s15, 6 }
   0xf   : > { %s1089_s30 = scalar_lea.vmem %s1251_s0, %s973_s27  ;;  %s262_s12 = scalar_lea.vmem %s1255_s4, %s968_s9 }
  0x10   : > { %v266_v4 = vld [vmem:[%s1089_s30 + $0x8] sm:$0xf]  ;;  %v1093_v5 = vld [vmem:[%s1089_s30 + $0x10] sm:$0xf]  ;;  %v264_v6 = vld [vmem:[%s1089_s30] sm:$0xf] }
  0x11   : > { %v302_v7 = vshrl.u32 %v266_v4, 16  ;;  %v305_v8 = vshll.u32 %v266_v4, 16  ;;  %v316_v9 = vshrl.u32 %v1093_v5, 16  ;;  %v319_v10 = vshll.u32 %v1093_v5, 16  ;;  %v265_v11 = vld [vmem:[%s1089_s30 + $0x4] sm:$0x1] }
  0x12   : > { %v471_v12 = vunpack.c.l.b16 %v266_v4  ;;  %v472_v13 = vunpack.c.l.b16 %v1093_v5  ;;  %v288_v14 = vshrl.u32 %v264_v6, 16  ;;  %v291_v15 = vshll.u32 %v264_v6, 16  ;;  %v267_v16 = vld [vmem:[%s1089_s30 + $0xc] sm:$0x1]  ;;  %v269_v17 = vld [vmem:[%s1089_s30 + $0x14] sm:$0x1] }
  0x13   : > { %v304_v18 = vrot.slane %v302_v7, 4  ;;  %v307_v19 = vrot.slane %v305_v8, 5  ;;  %v318_v20 = vrot.slane %v316_v9, 4  ;;  %v321_v21 = vrot.slane %v319_v10, 5  ;;  %v270_v22 = vld [vmem:[%s1089_s30 + $0x18] sm:$0xf] }
  0x14   : > { %v534_v23 = vpack.c.b16 %v472_v13, %v471_v12  ;;  %v290_v24 = vrot.slane %v288_v14, 4  ;;  %v293_v25 = vrot.slane %v291_v15, 5  ;;  %v470_v26 = vunpack.c.l.b16 %v264_v6  ;;  %v1113_v35 = vld [vmem:[%s1089_s30 + $0x20] sm:$0xf]  ;;  %v271_v48 = vld [vmem:[%s1089_s30 + $0x1c] sm:$0x1] }
  0x15   : > { %v297_v27 = vshll.u32 %v265_v11, 16  ;;  %v308_v28 = vor.u32 %v307_v19, %v304_v18  ;;  %v311_v29 = vshll.u32 %v267_v16, 16  ;;  %v322_v30 = vor.u32 %v321_v21, %v318_v20  ;;  %v273_v53 = vld [vmem:[%s1089_s30 + $0x24] sm:$0x1]  ;;  %v274_v7 = vld [vmem:[%s1089_s30 + $0x28] sm:$0xf] }
  0x16   : > { %952 = vmatmul.msk.bf16.vlgmr.msra.gmra.mxu2 %vm420_vm0, %v534_v23  ;;  %v478_v31 = vpack.c.b16 %v471_v12, %v470_v26  ;;  %v294_v33 = vor.u32 %v293_v25, %v290_v24  ;;  %v325_v34 = vshll.u32 %v269_v17, 16  ;;  %v330_v36 = vshrl.u32 %v270_v22, 16  ;;  %v1131_v8 = vld [vmem:[%s1089_s30 + $0x30] sm:$0xf]  ;;  %v277_v23 = vld [vmem:[%s1089_s30 + $0x34] sm:$0x1] }
  0x17   : > { %v299_v37 = vrot.slane %v297_v27, 5  ;;  %v309_v38 = vrot.slane %v308_v28, 4  ;;  %v313_v39 = vrot.slane %v311_v29, 5  ;;  %v323_v40 = vrot.slane %v322_v30, 4 }
  0x18   : > { %942 = vmatmul.msk.bf16.vlgmr.msra.gmra.mxu1 %vm420_vm0, %v478_v31  ;;  %v295_v41 = vrot.slane %v294_v33, 4  ;;  %v327_v42 = vrot.slane %v325_v34, 5  ;;  %v332_v43 = vrot.slane %v330_v36, 4  ;;  %v333_v44 = vshll.u32 %v270_v22, 16 }
  0x19   : > { %v314_v45 = vsel %vm1108_vm3, %v309_v38, %v313_v39  ;;  %v344_v46 = vshrl.u32 %v1113_v35, 16  ;;  %v347_v47 = vshll.u32 %v1113_v35, 16  ;;  %v339_v59 = vshll.u32 %v271_v48, 16  ;;  %v280_v38 = vld [vmem:[%s1089_s30 + $0x40] sm:$0xf] }
  0x1a   : > { %v300_v49 = vsel %vm1108_vm3, %v295_v41, %v299_v37  ;;  %v403_v50 = vunpack.c.l.b16 %v314_v45  ;;  %v328_v51 = vsel %vm1108_vm3, %v323_v40, %v327_v42  ;;  %v335_v52 = vrot.slane %v333_v44, 5  ;;  %v278_v37 = vld [vmem:[%s1089_s30 + $0x38] sm:$0xf] }
  0x1b   : > { %v402_v54 = vunpack.c.l.b16 %v300_v49  ;;  %v404_v55 = vunpack.c.l.b16 %v328_v51  ;;  %v346_v56 = vrot.slane %v344_v46, 4  ;;  %v349_v57 = vrot.slane %v347_v47, 5 }
  0x1c   : > { %v336_v58 = vor.u32 %v335_v52, %v332_v43  ;;  %v353_v63 = vshll.u32 %v273_v53, 16  ;;  %v473_v0 = vunpack.c.l.b16 %v270_v22  ;;  %v474_v1 = vunpack.c.l.b16 %v1113_v35  ;;  %v275_v22 = vld [vmem:[%s1089_s30 + $0x2c] sm:$0x1]  ;;  %v279_v53 = vld [vmem:[%s1089_s30 + $0x3c] sm:$0x1] }
  0x1d   : > { %v410_v60 = vpack.c.b16 %v403_v50, %v402_v54  ;;  %v611_v61 = vpack.c.b16 %v404_v55, %v403_v50  ;;  %v350_v62 = vor.u32 %v349_v57, %v346_v56  ;;  %v341_v3 = vrot.slane %v339_v59, 5  ;;  %v281_v54 = vld [vmem:[%s1089_s30 + $0x44] sm:$0x1] }
  0x1e   : > { %v337_v2 = vrot.slane %v336_v58, 4  ;;  %v355_v6 = vrot.slane %v353_v63, 5  ;;  %v535_v9 = vpack.c.b16 %v474_v1, %v473_v0  ;;  %v479_v10 = vpack.c.b16 %v473_v0, %v472_v13 }
  0x1f   : > { %934 = vmatmul.msk.bf16.vlgmr.msra.gmra.mxu0 %vm420_vm0, %v410_v60  ;;  %962 = vmatmul.msk.bf16.vlgmr.msra.gmra.mxu3 %vm420_vm0, %v611_v61  ;;  %v351_v4 = vrot.slane %v350_v62, 4  ;;  %v358_v11 = vshrl.u32 %v274_v7, 16  ;;  %v361_v12 = vshll.u32 %v274_v7, 16  ;;  %v372_v16 = vshrl.u32 %v1131_v8, 16 }
  0x20   : > { %v342_v14 = vsel %vm1108_vm3, %v337_v2, %v341_v3  ;;  %v375_v17 = vshll.u32 %v1131_v8, 16  ;;  %v367_v27 = vshll.u32 %v275_v22, 16  ;;  %v381_v29 = vshll.u32 %v277_v23, 16 }
  0x21   : > { %v356_v15 = vsel %vm1108_vm3, %v351_v4, %v355_v6  ;;  %v405_v18 = vunpack.c.l.b16 %v342_v14  ;;  %v360_v5 = vrot.slane %v358_v11, 4  ;;  %v363_v13 = vrot.slane %v361_v12, 5 }
  0x22   : > { %v406_v19 = vunpack.c.l.b16 %v356_v15  ;;  %v374_v20 = vrot.slane %v372_v16, 4  ;;  %v377_v21 = vrot.slane %v375_v17, 5  ;;  %v475_v30 = vunpack.c.l.b16 %v274_v7 }
  0x23   : > { %v411_v24 = vpack.c.b16 %v405_v18, %v404_v55  ;;  %v364_v26 = vor.u32 %v363_v13, %v360_v5  ;;  %v476_v31 = vunpack.c.l.b16 %v1131_v8  ;;  %v369_v34 = vrot.slane %v367_v27, 5 }
  0x24   : > { %v612_v25 = vpack.c.b16 %v406_v19, %v405_v18  ;;  %v378_v28 = vor.u32 %v377_v21, %v374_v20  ;;  %v383_v36 = vrot.slane %v381_v29, 5  ;;  %v480_v40 = vpack.c.b16 %v475_v30, %v474_v1 }
  0x25   : > { %v365_v33 = vrot.slane %v364_v26, 4  ;;  %v536_v39 = vpack.c.b16 %v476_v31, %v475_v30  ;;  %v386_v41 = vshrl.u32 %v278_v37, 16  ;;  %v389_v42 = vshll.u32 %v278_v37, 16 }
  0x26   : > { %953 = vmatmul.msk.bf16.gmra.mxu2 %vm420_vm0, %v535_v9  ;;  %v379_v35 = vrot.slane %v378_v28, 4  ;;  %v594_v45 = vshrl.u32 %v280_v38, 16  ;;  %v597_v46 = vshll.u32 %v280_v38, 16  ;;  %v395_v58 = vshll.u32 %v279_v53, 16 }
  0x27   : > { %v370_v43 = vsel %vm1108_vm3, %v365_v33, %v369_v34  ;;  %v388_v49 = vrot.slane %v386_v41, 4  ;;  %v391_v50 = vrot.slane %v389_v42, 5  ;;  %v603_v60 = vshll.u32 %v281_v54, 16 }
  0x28   : > { %943 = vmatmul.msk.bf16.gmra.mxu1 %vm420_vm0, %v479_v10  ;;  %v384_v44 = vsel %vm1108_vm3, %v379_v35, %v383_v36  ;;  %v407_v47 = vunpack.c.l.b16 %v370_v43  ;;  %v596_v51 = vrot.slane %v594_v45, 4  ;;  %v599_v52 = vrot.slane %v597_v46, 5 }
  0x29   : > { %v408_v48 = vunpack.c.l.b16 %v384_v44  ;;  %v392_v57 = vor.u32 %v391_v50, %v388_v49  ;;  %v477_v61 = vunpack.c.l.b16 %v278_v37  ;;  %v533_v62 = vunpack.c.l.b16 %v280_v38 }
  0x2a   : > { %v412_v55 = vpack.c.b16 %v407_v47, %v406_v19  ;;  %v600_v59 = vor.u32 %v599_v52, %v596_v51  ;;  %v397_v0 = vrot.slane %v395_v58, 5  ;;  %v605_v2 = vrot.slane %v603_v60, 5 }
  0x2b   : > { %v613_v56 = vpack.c.b16 %v408_v48, %v407_v47  ;;  %v393_v63 = vrot.slane %v392_v57, 4  ;;  %v537_v3 = vpack.c.b16 %v533_v62, %v477_v61  ;;  %v481_v4 = vpack.c.b16 %v477_v61, %v476_v31 }
  0x2c   : > { %v601_v1 = vrot.slane %v600_v59, 4 }
  0x2d   : > { %v398_v6 = vsel %vm1108_vm3, %v393_v63, %v397_v0 }
  0x2e   : > { %v606_v7 = vsel %vm1108_vm3, %v601_v1, %v605_v2  ;;  %v409_v8 = vunpack.c.l.b16 %v398_v6 }
  0x2f   : > { %935 = vmatmul.msk.bf16.gmra.mxu0 %vm420_vm0, %v411_v24  ;;  %963 = vmatmul.msk.bf16.gmra.mxu3 %vm420_vm0, %v612_v25  ;;  %v610_v9 = vunpack.c.l.b16 %v606_v7 }
  0x30   : > { %v413_v10 = vpack.c.b16 %v409_v8, %v408_v48 }
  0x31   : > { %v614_v11 = vpack.c.b16 %v610_v9, %v409_v8 }
  0x36   : > { %954 = vmatmul.msk.bf16.gmra.mxu2 %vm420_vm0, %v536_v39 }
  0x38   : > { %944 = vmatmul.msk.bf16.gmra.mxu1 %vm420_vm0, %v480_v40 }
  0x3f   : > { %936 = vmatmul.msk.bf16.gmra.mxu0 %vm420_vm0, %v412_v55  ;;  %964 = vmatmul.msk.bf16.gmra.mxu3 %vm420_vm0, %v613_v56  ;;  %v1027_v56 = vmov 64.0  }
  0x40   : > { %999 = vrcp.f32 %v1027_v56 }
  0x46   : > { %955 = vmatmul.msk.bf16.gmra.mxu2 %vm420_vm0, %v537_v3  ;;  %v1000_v8 = vpop.eup %999 }
  0x47   : > { %vm697_vm5 = vweird.f32 %v1000_v8 }
  0x48   : > { %945 = vmatmul.msk.bf16.gmra.mxu1 %vm420_vm0, %v481_v4 }
  0x4f   : > { %937 = vmatmul.msk.bf16.gmra.mxu0 %vm420_vm0, %v413_v10  ;;  %965 = vmatmul.msk.bf16.gmra.mxu3 %vm420_vm0, %v614_v11 }
  0x95   : > { %v509_v12 = vpop.f32.mrf.mxu1 }
  0x99   : > { %v565_v14 = vpop.f32.mrf.mxu2 }
  0x9c   : > { %v442_v15 = vpop.f32.mrf.mxu0 }
  0x9d   : > { %v511_v16 = vpop.f32.mrf.mxu1  ;;  %v510_v31 = vadd.f32 %v509_v12, %v442_v15 }
  0x9f   : > { %v585_v37 = vadd.f32 %v565_v14, %v510_v31 }
  0xa1   : > { %v567_v17 = vpop.f32.mrf.mxu2 }
  0xa2   : > { %v642_v18 = vpop.f32.mrf.mxu3 }
  0xa3   : > { %v1170_v45 = vadd.f32 %v642_v18, %v585_v37 }
  0xa4   : > { %v444_v32 = vpop.f32.mrf.mxu0 }
  0xa5   : > { %v514_v19 = vpop.f32.mrf.mxu1  ;;  %v512_v36 = vadd.f32 %v511_v16, %v444_v32  ;;  %v671_v55 = vsel %vm670_vm4, %v1170_v45, 0.0  ;;  %v693_v16 = vmul.f32 64.0, %v1000_v8 }
  0xa7   : > { %v586_v40 = vadd.f32 %v567_v17, %v512_v36 }
  0xa9   : > { %v570_v5 = vpop.f32.mrf.mxu2 }
  0xaa   : > { %v644_v13 = vpop.f32.mrf.mxu3 }
  0xab   : > { %v1168_v44 = vadd.f32 %v644_v13, %v586_v40  ;;  %v694_v13 = vsub.f32 1.0, %v693_v16 }
  0xac   : > { %v447_v20 = vpop.f32.mrf.mxu0 }
  0xad   : > { %v516_v21 = vpop.f32.mrf.mxu1  ;;  %v515_v33 = vadd.f32 %v514_v19, %v447_v20  ;;  %v672_v53 = vsel %vm670_vm4, %v1168_v44, 0.0 }
  0xae   : > { %v673_v61 = vadd.f32 %v672_v53, %v671_v55 }
  0xaf   : > { %v587_v38 = vadd.f32 %v570_v5, %v515_v33 }
  0xb1   : > { %v572_v22 = vpop.f32.mrf.mxu2 }
  0xb2   : > { %v647_v23 = vpop.f32.mrf.mxu3 }
  0xb3   : > { %v1172_v46 = vadd.f32 %v647_v23, %v587_v38 }
  0xb4   : > { %v449_v24 = vpop.f32.mrf.mxu0 }
  0xb5   : > { %v519_v25 = vpop.f32.mrf.mxu1  ;;  %v517_v39 = vadd.f32 %v516_v21, %v449_v24  ;;  %v674_v57 = vsel %vm670_vm4, %v1172_v46, 0.0 }
  0xb6   : > { %v675_v1 = vadd.f32 %v674_v57, %v673_v61 }
  0xb7   : > { %v588_v47 = vadd.f32 %v572_v22, %v517_v39  ;;  %v695_v22 = vmul.f32 %v1000_v8, %v694_v13  ;;  %v738_v13 = vld [vmem:[%s1253_s2] sm:$0x1] }
  0xb9   : > { %v575_v26 = vpop.f32.mrf.mxu2 }
  0xba   : > { %v649_v27 = vpop.f32.mrf.mxu3 }
  0xbb   : > { %v1176_v54 = vadd.f32 %v649_v27, %v588_v47 }
  0xbc   : > { %v452_v28 = vpop.f32.mrf.mxu0 }
  0xbd   : > { %v521_v29 = vpop.f32.mrf.mxu1  ;;  %v520_v41 = vadd.f32 %v519_v25, %v452_v28  ;;  %v676_v63 = vsel %vm670_vm4, %v1176_v54, 0.0  ;;  %v696_v25 = vadd.f32 %v1000_v8, %v695_v22 }
  0xbe   : > { %v677_v9 = vadd.f32 %v676_v63, %v675_v1 }
  0xbf   : > { %v589_v49 = vadd.f32 %v575_v26, %v520_v41  ;;  %v698_v28 = vsel %vm697_vm5, %v1000_v8, %v696_v25 }
  0xc1   : > { %v577_v34 = vpop.f32.mrf.mxu2 }
  0xc2   : > { %v652_v30 = vpop.f32.mrf.mxu3 }
  0xc3   : > { %v1182_v58 = vadd.f32 %v652_v30, %v589_v49 }
  0xc4   : > { %v454_v35 = vpop.f32.mrf.mxu0 }
  0xc5   : > { %v524_v42 = vpop.f32.mrf.mxu1  ;;  %v522_v50 = vadd.f32 %v521_v29, %v454_v35  ;;  %v678_v4 = vsel %vm670_vm4, %v1182_v58, 0.0 }
  0xc6   : > { %v679_v11 = vadd.f32 %v678_v4, %v677_v9 }
  0xc7   : > { %v590_v59 = vadd.f32 %v577_v34, %v522_v50 }
  0xc9   : > { %v580_v52 = vpop.f32.mrf.mxu2 }
  0xca   : > { %v654_v43 = vpop.f32.mrf.mxu3 }
  0xcb   : > { %v1186_v0 = vadd.f32 %v654_v43, %v590_v59 }
  0xcc   : > { %v457_v48 = vpop.f32.mrf.mxu0 }
  0xcd   : > { %v525_v51 = vadd.f32 %v524_v42, %v457_v48  ;;  %v526_v2 = vpop.f32.mrf.mxu1  ;;  %v680_v10 = vsel %vm670_vm4, %v1186_v0, 0.0 }
  0xce   : > { %v681_v17 = vadd.f32 %v680_v10, %v679_v11 }
  0xcf   : > { %v591_v60 = vadd.f32 %v580_v52, %v525_v51 }
  0xd1   : > { %v582_v12 = vpop.f32.mrf.mxu2 }
  0xd2   : > { %v657_v62 = vpop.f32.mrf.mxu3 }
  0xd3   : > { %v1190_v6 = vadd.f32 %v657_v62, %v591_v60 }
  0xd4   : > { %v459_v3 = vpop.f32.mrf.mxu0 }
  0xd5   : > { %v527_v7 = vadd.f32 %v526_v2, %v459_v3  ;;  %v682_v14 = vsel %vm670_vm4, %v1190_v6, 0.0 }
  0xd6   : > { %v683_v19 = vadd.f32 %v682_v14, %v681_v17 }
  0xd7   : > { %v592_v15 = vadd.f32 %v582_v12, %v527_v7 }
  0xda   : > { %v659_v18 = vpop.f32.mrf.mxu3 }
  0xdb   : > { %v1196_v32 = vadd.f32 %v659_v18, %v592_v15 }
  0xdd   : > { %v684_v5 = vsel %vm670_vm4, %v1196_v32, 0.0 }
  0xde   : > { %v685_v20 = vadd.f32 %v684_v5, %v683_v19 }
  0xe0   : > { %v686_v21 = vrot.slane %v685_v20, 4 }
  0xe2   : > { %v687_v23 = vadd.f32 %v686_v21, %v685_v20 }
  0xe4   : > { %v688_v24 = vrot.slane %v687_v23, 2 }
  0xe6   : > { %v689_v26 = vadd.f32 %v688_v24, %v687_v23  ;;  %v751_v23 = vld [vmem:[%s1254_s3] sm:$0x1] }
  0xe8   : > { %v690_v27 = vrot.slane %v689_v26, 1 }
  0xea   : > { %v691_v29 = vadd.f32 %v690_v27, %v689_v26 }
  0xec   : > { %v699_v30 = vmul.f32 %v698_v28, %v691_v29 }
  0xee   : > { %v700_v31 = vsub.f32 %v1170_v45, %v699_v30  ;;  %v701_v33 = vsub.f32 %v1168_v44, %v699_v30  ;;  %v702_v34 = vsub.f32 %v1172_v46, %v699_v30  ;;  %v703_v35 = vsub.f32 %v1176_v54, %v699_v30 }
  0xef   : > { %v704_v36 = vsub.f32 %v1182_v58, %v699_v30  ;;  %v705_v40 = vsub.f32 %v1186_v0, %v699_v30  ;;  %v706_v48 = vsub.f32 %v1190_v6, %v699_v30  ;;  %v707_v52 = vsub.f32 %v1196_v32, %v699_v30 }
  0xf0   : > { %v708_v37 = vmul.f32 %v700_v31, %v700_v31  ;;  %v709_v38 = vmul.f32 %v701_v33, %v701_v33  ;;  %v710_v39 = vmul.f32 %v702_v34, %v702_v34  ;;  %v711_v41 = vmul.f32 %v703_v35, %v703_v35 }
  0xf1   : > { %v712_v49 = vmul.f32 %v704_v36, %v704_v36  ;;  %v713_v53 = vmul.f32 %v705_v40, %v705_v40  ;;  %v714_v57 = vmul.f32 %v706_v48, %v706_v48  ;;  %v715_v61 = vmul.f32 %v707_v52, %v707_v52 }
  0xf2   : > { %v716_v42 = vsel %vm670_vm4, %v708_v37, 0.0  ;;  %v717_v43 = vsel %vm670_vm4, %v709_v38, 0.0  ;;  %v719_v50 = vsel %vm670_vm4, %v710_v39, 0.0  ;;  %v721_v55 = vsel %vm670_vm4, %v711_v41, 0.0 }
  0xf3   : > { %v718_v47 = vadd.f32 %v717_v43, %v716_v42  ;;  %v723_v59 = vsel %vm670_vm4, %v712_v49, 0.0  ;;  %v725_v62 = vsel %vm670_vm4, %v713_v53, 0.0  ;;  %v727_v1 = vsel %vm670_vm4, %v714_v57, 0.0 }
  0xf4   : > { %v729_v3 = vsel %vm670_vm4, %v715_v61, 0.0 }
  0xf5   : > { %v720_v51 = vadd.f32 %v719_v50, %v718_v47 }
  0xf7   : > { %v722_v56 = vadd.f32 %v721_v55, %v720_v51 }
  0xf9   : > { %v724_v60 = vadd.f32 %v723_v59, %v722_v56 }
  0xfb   : > { %v726_v63 = vadd.f32 %v725_v62, %v724_v60 }
  0xfd   : > { %v728_v2 = vadd.f32 %v727_v1, %v726_v63 }
  0xff   : > { %v730_v4 = vadd.f32 %v729_v3, %v728_v2 }
 0x101   : > { %v731_v7 = vrot.slane %v730_v4, 4 }
 0x103   : > { %v732_v8 = vadd.f32 %v731_v7, %v730_v4 }
 0x105   : > { %v733_v9 = vrot.slane %v732_v8, 2 }
 0x107   : > { %v734_v10 = vadd.f32 %v733_v9, %v732_v8 }
 0x109   : > { %v735_v11 = vrot.slane %v734_v10, 1 }
 0x10b   : > { %v736_v12 = vadd.f32 %v735_v11, %v734_v10 }
 0x10d   : > { %v737_v14 = vmul.f32 %v736_v12, %v698_v28 }
 0x10f   : > { %v739_v15 = vadd.f32 1e-05, %v737_v14 }
 0x111   : > { %1001 = vrsqrt.f32 %v739_v15  ;;  %vm746_vm7 = vweird.f32 %v739_v15 }
 0x117   : > { %v1002_v16 = vpop.eup %1001 }
 0x118   : > { %v741_v17 = vmul.f32 %v1002_v16, %v739_v15  ;;  %vm747_vm6 = vweird.f32 %v1002_v16 }
 0x119   : > { %vm748_vm8 = vmor %vm746_vm7, %vm747_vm6 }
 0x11a   : > { %v742_v18 = vmul.f32 %v1002_v16, %v741_v17 }
 0x11c   : > { %v743_v19 = vmul.f32 0.5, %v742_v18 }
 0x11e   : > { %v744_v5 = vsub.f32 1.5, %v743_v19 }
 0x120   : > { %v745_v20 = vmul.f32 %v1002_v16, %v744_v5 }
 0x122   : > { %v749_v21 = vsel %vm748_vm8, %v1002_v16, %v745_v20 }
 0x123   : > { %v750_v22 = vmul.f32 %v749_v21, %v738_v13 }
 0x125   : > { %v752_v24 = vmul.f32 %v750_v22, %v699_v30  ;;  %v755_v25 = vperm.slane %v750_v22, 0 }
 0x127   : > { %v753_v26 = vsub.f32 %v751_v23, %v752_v24  ;;  %v757_v27 = vmul.f32 %v755_v25, %v1170_v45  ;;  %v758_v28 = vmul.f32 %v755_v25, %v1168_v44  ;;  %v759_v29 = vmul.f32 %v755_v25, %v1172_v46 }
 0x128   : > { %v760_v31 = vmul.f32 %v755_v25, %v1176_v54  ;;  %v761_v34 = vmul.f32 %v755_v25, %v1182_v58  ;;  %v762_v35 = vmul.f32 %v755_v25, %v1186_v0  ;;  %v763_v36 = vmul.f32 %v755_v25, %v1190_v6 }
 0x129   : > { %v766_v33 = vperm.slane %v753_v26, 0  ;;  %v764_v37 = vmul.f32 %v755_v25, %v1196_v32 }
 0x12b   : > { %v768_v30 = vadd.f32 %v766_v33, %v757_v27  ;;  %v769_v38 = vadd.f32 %v766_v33, %v758_v28  ;;  %v770_v39 = vadd.f32 %v766_v33, %v759_v29  ;;  %v771_v45 = vadd.f32 %v766_v33, %v760_v31 }
 0x12c   : > { %v772_v40 = vadd.f32 %v766_v33, %v761_v34  ;;  %v773_v44 = vadd.f32 %v766_v33, %v762_v35  ;;  %v774_v41 = vadd.f32 %v766_v33, %v763_v36  ;;  %v775_v46 = vadd.f32 %v766_v33, %v764_v37 }
 0x12d   : > { %v776_v42 = vmul.f32 0.2, %v768_v30  ;;  %v777_v54 = vmul.f32 0.2, %v769_v38  ;;  %v778_v43 = vmul.f32 0.2, %v770_v39 }
 0x12e   : > { %v779_v58 = vmul.f32 0.2, %v771_v45  ;;  %v780_v0 = vmul.f32 0.2, %v772_v40  ;;  %v781_v6 = vmul.f32 0.2, %v773_v44 }
 0x12f   : > { %v782_v32 = vmul.f32 0.2, %v774_v41  ;;  %v784_v47 = vmax.f32 %v768_v30, %v776_v42  ;;  %v785_v48 = vmax.f32 %v769_v38, %v777_v54  ;;  %v783_v49 = vmul.f32 0.2, %v775_v46 }
 0x130   : > { %v786_v50 = vmax.f32 %v770_v39, %v778_v43  ;;  %v787_v51 = vmax.f32 %v771_v45, %v779_v58  ;;  %v788_v52 = vmax.f32 %v772_v40, %v780_v0  ;;  %v789_v53 = vmax.f32 %v773_v44, %v781_v6 }
 0x131   : > { %792 = vst.msk [vmem:[%s262_s12] sm:$0xff] %vm670_vm4, %v784_v47  ;;  %v790_v55 = vmax.f32 %v774_v41, %v782_v32  ;;  %v791_v56 = vmax.f32 %v775_v46, %v783_v49 }
 0x132   : > { %793 = vst.msk [vmem:[%s262_s12 + $0x8] sm:$0xff] %vm670_vm4, %v785_v48 }
 0x133   : > { %794 = vst.msk [vmem:[%s262_s12 + $0x10] sm:$0xff] %vm670_vm4, %v786_v50 }
 0x134   : > { %795 = vst.msk [vmem:[%s262_s12 + $0x18] sm:$0xff] %vm670_vm4, %v787_v51 }
 0x135   : > { %796 = vst.msk [vmem:[%s262_s12 + $0x20] sm:$0xff] %vm670_vm4, %v788_v52 }
 0x136   : > { %797 = vst.msk [vmem:[%s262_s12 + $0x28] sm:$0xff] %vm670_vm4, %v789_v53 }
 0x137   : > { %798 = vst.msk [vmem:[%s262_s12 + $0x30] sm:$0xff] %vm670_vm4, %v790_v55 }
 0x138   : > { %799 = vst.msk [vmem:[%s262_s12 + $0x38] sm:$0xff] %vm670_vm4, %v791_v56 }
 0x139 PF: > { %s14_s17 = sadd.s32 1, %s1025_s17   ;;  %s1258_s15 = smov %s1021_s16 }
 0x13a   : > { %p11_p5 = scmp.ge.s32.totalorder %s14_s17, 4   ;;  %s1259_s16 = smov %s1261_s18 }
 0x13c   :  { %13 = sbr.rel (!%p11_p5) target bundleno = 2 (0x2), region = 78 }

</bundles_post_ra>
